<compile_context>
chip_gen: v7x
topology: tpu7x:2x2x1
jax: 0.10.0
libtpu: 0.0.40
codegen_flags: <defaults>
</compile_context>

<pallas_src>
import functools
import math

import jax
import jax.numpy as jnp
from jax import lax
from jax.experimental import pallas as pl
from jax.experimental.pallas import tpu as pltpu

_LANES = 128
_SUBLANES = 8
_MAX_BLOCK_BYTES = 4 * 1024 * 1024   # per-input block cap (v7x-safe)
_CHUNK_GROUPS = 8                    # groups per fused inner-loop step
_NCORE_SPLIT = 2                     # leading parallel axis for v7x megacore


def _largest_divisor_leq(n, cap):
    for d in range(min(cap, n), 0, -1):
        if n % d == 0:
            return d
    return 1


def _tversky_sums_kernel(x_ref, t_ref, pt_ref, sp_ref, st_ref, s2_ref, *,
                         g_tile, chunk, groups_total, tiles_per_core):
    """Accumulate lane-dense (sub,128) partials of p*t, p, t, (1-p)(1-t)."""
    c = pl.program_id(0)   # core-split index (v7x megacore)
    r = pl.program_id(2)   # feature-tile index (reduction axis)

    @pl.when(r == 0)
    def _():
        for ref in (pt_ref, sp_ref, st_ref, s2_ref):
            ref[...] = jnp.zeros_like(ref)

    # Number of valid groups in this *logical* tile; <= 0 for the clamped
    # duplicate tiles of the core split, < g_tile for the ragged last tile.
    logical_tile = c * tiles_per_core + r
    valid = groups_total - logical_tile * g_tile          # traced int32 scalar

    sub, lanes = x_ref.shape[1], x_ref.shape[2]
    gidx = lax.broadcasted_iota(jnp.int32, (chunk, sub, lanes), 0)

    def body(i, carry):
        pt, sp, st, s2 = carry
        start = pl.multiple_of(i * chunk, chunk)
        m = gidx < (valid - start)                         # group validity mask
        mf = m.astype(jnp.float32)
        x = jnp.where(m, x_ref[pl.ds(start, chunk)].astype(jnp.float32), 0.0)
        t = jnp.where(m, t_ref[pl.ds(start, chunk)].astype(jnp.float32), 0.0)
        # sigmoid as tanh: one EUP op instead of exp + divide.
        p = (0.5 * jnp.tanh(0.5 * x) + 0.5) * mf
        pt_e = p * t
        pt = pt + jnp.sum(pt_e, axis=0)
        sp = sp + jnp.sum(p, axis=0)
        st = st + jnp.sum(t, axis=0)
        # (1-p)(1-t) accumulated directly (exact 0 on masked elements).
        s2 = s2 + jnp.sum(mf - p - t + pt_e, axis=0)
        return pt, sp, st, s2

    zero = jnp.zeros((sub, lanes), jnp.float32)
    pt, sp, st, s2 = lax.fori_loop(0, g_tile // chunk, body,
                                   (zero, zero, zero, zero))
    pt_ref[...] += pt
    sp_ref[...] += sp
    st_ref[...] += st
    s2_ref[...] += s2


@functools.partial(jax.jit, static_argnames=("eps", "recall", "precision"))
def tversky_focal(inputs, targets, eps=1e-6, recall=0.7, precision=0.3):
    """JAX/Pallas equivalent of TverskyFocal().forward(inputs, targets)."""
    B = inputs.shape[0]
    N = math.prod(inputs.shape[1:])

    # Native sublane height for the narrower input dtype so bf16/int8 inputs
    # keep their packed (16,128)/(32,128) tiles (no relayout on load).
    min_item = min(inputs.dtype.itemsize, targets.dtype.itemsize)
    max_item = max(inputs.dtype.itemsize, targets.dtype.itemsize)
    sub = _SUBLANES * max(1, 4 // min_item)      # 8 (f32), 16 (bf16), 32 (i8)
    group = sub * _LANES

    x2d = inputs.reshape(B, N)
    t2d = targets.reshape(B, N)

    G = N // group                               # whole groups -> kernel
    n_main = G * group
    tail = N - n_main

    if G > 0:
        max_groups = max(1, _MAX_BLOCK_BYTES // (sub * _LANES * max_item))
        g_tile = min(G, max_groups)              # never exceeds the array dim
        chunk = _largest_divisor_leq(g_tile, _CHUNK_GROUPS)
        num_tiles = pl.cdiv(G, g_tile)
        tiles_per_core = pl.cdiv(num_tiles, _NCORE_SPLIT)
        last_tile = num_tiles - 1

        if tail == 0:
            x4 = x2d.reshape(B, G, sub, _LANES)  # pure bitcast reshape
            t4 = t2d.reshape(B, G, sub, _LANES)
        else:
            # TODO(synk): for B>1 this aligned-prefix slice may still cost one
            # HBM copy in XLA; only the (<group)-element tail goes through jnp.
            x4 = lax.slice(x2d, (0, 0), (B, n_main)).reshape(B, G, sub, _LANES)
            t4 = lax.slice(t2d, (0, 0), (B, n_main)).reshape(B, G, sub, _LANES)

        def in_map(c, b, r):
            # Clamp so no block is fully out of bounds; duplicate (clamped)
            # tiles are zeroed by the in-kernel validity mask.
            return (b, jnp.minimum(c * tiles_per_core + r, last_tile), 0, 0)

        in_spec = pl.BlockSpec((None, g_tile, sub, _LANES), in_map)
        acc_spec = pl.BlockSpec((None, None, sub, _LANES),
                                lambda c, b, r: (c, b, 0, 0))
        acc_shape = jax.ShapeDtypeStruct((_NCORE_SPLIT, B, sub, _LANES),
                                         jnp.float32)

        kernel = functools.partial(
            _tversky_sums_kernel, g_tile=g_tile, chunk=chunk,
            groups_total=G, tiles_per_core=tiles_per_core)

        elems = B * n_main
        pt_o, sp_o, st_o, s2_o = pl.pallas_call(
            kernel,
            out_shape=(acc_shape,) * 4,
            grid_spec=pltpu.PrefetchScalarGridSpec(
                num_scalar_prefetch=0,
                grid=(_NCORE_SPLIT, B, tiles_per_core),
                in_specs=[in_spec, in_spec],
                out_specs=(acc_spec,) * 4,
            ),
            compiler_params=pltpu.CompilerParams(
                dimension_semantics=("parallel", "parallel", "arbitrary"),
                vmem_limit_bytes=32 * 1024 * 1024,
            ),
            cost_estimate=pl.CostEstimate(
                flops=14 * elems,
                transcendentals=elems,
                bytes_accessed=(x4.size * x4.dtype.itemsize
                                + t4.size * t4.dtype.itemsize
                                + 4 * _NCORE_SPLIT * B * sub * _LANES * 4),
            ),
        )(x4, t4)

        s1 = jnp.sum(pt_o, axis=(0, 2, 3))       # per-batch sum p*t
        sp = jnp.sum(sp_o, axis=(0, 2, 3))       # per-batch sum p
        st = jnp.sum(st_o, axis=(0, 2, 3))       # per-batch sum t
        s2 = jnp.sum(s2_o, axis=(0, 2, 3))       # per-batch sum (1-p)(1-t)
    else:
        s1 = sp = st = s2 = jnp.zeros((B,), jnp.float32)

    if tail > 0:                                 # < one group per batch: tiny
        xt = lax.slice(x2d, (0, n_main), (B, N)).astype(jnp.float32)
        tt = lax.slice(t2d, (0, n_main), (B, N)).astype(jnp.float32)
        p_t = jax.nn.sigmoid(xt)
        s1 = s1 + jnp.sum(p_t * tt, axis=-1)
        sp = sp + jnp.sum(p_t, axis=-1)
        st = st + jnp.sum(tt, axis=-1)
        s2 = s2 + jnp.sum((1.0 - p_t) * (1.0 - tt), axis=-1)

    # f1/f2 are GLOBAL sums, s1/s2 per-batch -- matches the PyTorch reference.
    f1 = jnp.sum(sp - s1)                        # global sum p(1-t)
    f2 = jnp.sum(st - s1)                        # global sum (1-p)t

    term1 = (s1 + eps) / (s1 + recall * f2 + precision * f1 + eps)
    term2 = (s2 + eps) / (s2 + precision * f2 + recall * f1 + eps)
    return jnp.mean(2.0 - term1 - term2)


def _tversky_focal_ref(inputs, targets, eps=1e-6, recall=0.7, precision=0.3):
    """Pure-JAX reference mirroring the PyTorch forward (no masks)."""
    B = inputs.shape[0]
    probs = jax.nn.sigmoid(inputs.astype(jnp.float32)).reshape(B, -1)
    t = targets.astype(jnp.float32).reshape(B, -1)
    n1 = probs * t
    n2 = (1.0 - probs) * (1.0 - t)
    f1 = jnp.sum(probs * (1.0 - t))
    f2 = jnp.sum((1.0 - probs) * t)
    s1 = jnp.sum(n1, axis=-1)
    s2 = jnp.sum(n2, axis=-1)
    return jnp.mean(
        2.0
        - (s1 + eps) / (s1 + recall * f2 + precision * f1 + eps)
        - (s2 + eps) / (s2 + precision * f2 + recall * f1 + eps)
    )


if __name__ == "__main__":
    key = jax.random.PRNGKey(0)
    k1, k2 = jax.random.split(key)

    B, C, H, W = 2, 4, 16, 16
    inputs = jax.random.normal(k1, (B, C, H, W), dtype=jnp.float32)
    targets = (jax.random.uniform(k2, (B, C, H, W)) > 0.5).astype(jnp.float32)

    loss = jax.block_until_ready(tversky_focal(inputs, targets))
    ref = jax.block_until_ready(_tversky_focal_ref(inputs, targets))
    assert jnp.allclose(loss, ref, rtol=1e-4, atol=2e-5), (loss, ref)

    print("KERNEL_OK")
</pallas_src>

<mosaic_0001>
module attributes {stable_mosaic.version = 11 : i64} {
  func.func @_tversky_sums_kernel(%arg0: i32, %arg1: i32, %arg2: i32, %arg3: memref<1x1x8x128xf32, #tpu.memory_space<vmem>>, %arg4: memref<1x1x8x128xf32, #tpu.memory_space<vmem>>, %arg5: memref<1x1x8x128xf32, #tpu.memory_space<vmem>>, %arg6: memref<1x1x8x128xf32, #tpu.memory_space<vmem>>, %arg7: memref<1x1x8x128xf32, #tpu.memory_space<vmem>>, %arg8: memref<1x1x8x128xf32, #tpu.memory_space<vmem>>) attributes {dimension_semantics = [#tpu.dimension_semantics<parallel>, #tpu.dimension_semantics<parallel>, #tpu.dimension_semantics<arbitrary>], iteration_bounds = array<i64: 2, 2, 1>, scalar_prefetch = 0 : i64, scratch_operands = 0 : i64, tpu.core_type = #tpu.core_type<tc>, window_params = [{transform_indices = @transform_0, window_bounds = array<i64: 1, 1, 8, 128>}, {transform_indices = @transform_1, window_bounds = array<i64: 1, 1, 8, 128>}, {transform_indices = @transform_2, window_bounds = array<i64: 1, 1, 8, 128>}, {transform_indices = @transform_3, window_bounds = array<i64: 1, 1, 8, 128>}, {transform_indices = @transform_4, window_bounds = array<i64: 1, 1, 8, 128>}, {transform_indices = @transform_5, window_bounds = array<i64: 1, 1, 8, 128>}]} {
    %c0_i32 = arith.constant 0 : i32
    %0 = arith.cmpi eq, %arg2, %c0_i32 : i32
    %1 = arith.extui %0 : i1 to i32
    %c0_i32_0 = arith.constant 0 : i32
    %2 = arith.cmpi ne, %1, %c0_i32_0 : i32
    scf.if %2 {
      %cst_52 = arith.constant 0.000000e+00 : f32
      %70 = vector.broadcast %cst_52 : f32 to vector<8x128xf32>
      %c0_53 = arith.constant 0 : index
      %c0_54 = arith.constant 0 : index
      %c0_55 = arith.constant 0 : index
      %c0_56 = arith.constant 0 : index
      %71 = vector.load %arg5[%c0_53, %c0_54, %c0_55, %c0_56] : memref<1x1x8x128xf32, #tpu.memory_space<vmem>>, vector<1x1x8x128xf32>
      %72 = vector.shape_cast %71 : vector<1x1x8x128xf32> to vector<8x128xf32>
      %73 = vector.shape_cast %70 : vector<8x128xf32> to vector<1x1x8x128xf32>
      tpu.vector_store %arg5[%c0_53, %c0_54, %c0_55, %c0_56], %73 {strides = array<i32>} : memref<1x1x8x128xf32, #tpu.memory_space<vmem>>, vector<1x1x8x128xf32>,
      %cst_57 = arith.constant 0.000000e+00 : f32
      %74 = vector.broadcast %cst_57 : f32 to vector<8x128xf32>
      %c0_58 = arith.constant 0 : index
      %c0_59 = arith.constant 0 : index
      %c0_60 = arith.constant 0 : index
      %c0_61 = arith.constant 0 : index
      %75 = vector.load %arg6[%c0_58, %c0_59, %c0_60, %c0_61] : memref<1x1x8x128xf32, #tpu.memory_space<vmem>>, vector<1x1x8x128xf32>
      %76 = vector.shape_cast %75 : vector<1x1x8x128xf32> to vector<8x128xf32>
      %77 = vector.shape_cast %74 : vector<8x128xf32> to vector<1x1x8x128xf32>
      tpu.vector_store %arg6[%c0_58, %c0_59, %c0_60, %c0_61], %77 {strides = array<i32>} : memref<1x1x8x128xf32, #tpu.memory_space<vmem>>, vector<1x1x8x128xf32>,
      %cst_62 = arith.constant 0.000000e+00 : f32
      %78 = vector.broadcast %cst_62 : f32 to vector<8x128xf32>
      %c0_63 = arith.constant 0 : index
      %c0_64 = arith.constant 0 : index
      %c0_65 = arith.constant 0 : index
      %c0_66 = arith.constant 0 : index
      %79 = vector.load %arg7[%c0_63, %c0_64, %c0_65, %c0_66] : memref<1x1x8x128xf32, #tpu.memory_space<vmem>>, vector<1x1x8x128xf32>
      %80 = vector.shape_cast %79 : vector<1x1x8x128xf32> to vector<8x128xf32>
      %81 = vector.shape_cast %78 : vector<8x128xf32> to vector<1x1x8x128xf32>
      tpu.vector_store %arg7[%c0_63, %c0_64, %c0_65, %c0_66], %81 {strides = array<i32>} : memref<1x1x8x128xf32, #tpu.memory_space<vmem>>, vector<1x1x8x128xf32>,
      %cst_67 = arith.constant 0.000000e+00 : f32
      %82 = vector.broadcast %cst_67 : f32 to vector<8x128xf32>
      %c0_68 = arith.constant 0 : index
      %c0_69 = arith.constant 0 : index
      %c0_70 = arith.constant 0 : index
      %c0_71 = arith.constant 0 : index
      %83 = vector.load %arg8[%c0_68, %c0_69, %c0_70, %c0_71] : memref<1x1x8x128xf32, #tpu.memory_space<vmem>>, vector<1x1x8x128xf32>
      %84 = vector.shape_cast %83 : vector<1x1x8x128xf32> to vector<8x128xf32>
      %85 = vector.shape_cast %82 : vector<8x128xf32> to vector<1x1x8x128xf32>
      tpu.vector_store %arg8[%c0_68, %c0_69, %c0_70, %c0_71], %85 {strides = array<i32>} : memref<1x1x8x128xf32, #tpu.memory_space<vmem>>, vector<1x1x8x128xf32>,
    } else {
    }
    %c1_i32 = arith.constant 1 : i32
    %3 = arith.muli %arg0, %c1_i32 : i32
    %4 = arith.addi %3, %arg2 : i32
    %c1_i32_1 = arith.constant 1 : i32
    %5 = arith.muli %4, %c1_i32_1 : i32
    %c1_i32_2 = arith.constant 1 : i32
    %6 = arith.subi %c1_i32_2, %5 : i32
    %7 = tpu.iota {dimensions = array<i32: 0>} : vector<1x8x128xi32>
    %cst = arith.constant 0.000000e+00 : f32
    %8 = vector.broadcast %cst : f32 to vector<8x128xf32>
    %c0_i32_3 = arith.constant 0 : i32
    %c1_i32_4 = arith.constant 1 : i32
    %9 = arith.muli %c0_i32_3, %c1_i32_4 : i32
    %10 = tpu.assume_multiple %9, 1 : i32
    %11 = arith.subi %6, %10 : i32
    %12 = vector.broadcast %11 : i32 to vector<1x8x128xi32>
    %13 = arith.cmpi slt, %7, %12 : vector<1x8x128xi32>
    %14 = arith.extui %13 : vector<1x8x128xi1> to vector<1x8x128xi32>
    %15 = arith.sitofp %14 : vector<1x8x128xi32> to vector<1x8x128xf32>
    %c0 = arith.constant 0 : index
    %16 = arith.index_cast %10 : i32 to index
    %c0_5 = arith.constant 0 : index
    %c0_6 = arith.constant 0 : index
    %17 = vector.load %arg3[%c0, %16, %c0_5, %c0_6] : memref<1x1x8x128xf32, #tpu.memory_space<vmem>>, vector<1x1x8x128xf32>
    %18 = vector.shape_cast %17 : vector<1x1x8x128xf32> to vector<1x8x128xf32>
    %cst_7 = arith.constant 0.000000e+00 : f32
    %19 = vector.broadcast %cst_7 : f32 to vector<1x8x128xf32>
    %20 = arith.select %13, %18, %19 : vector<1x8x128xi1>, vector<1x8x128xf32>
    %c0_8 = arith.constant 0 : index
    %21 = arith.index_cast %10 : i32 to index
    %c0_9 = arith.constant 0 : index
    %c0_10 = arith.constant 0 : index
    %22 = vector.load %arg4[%c0_8, %21, %c0_9, %c0_10] : memref<1x1x8x128xf32, #tpu.memory_space<vmem>>, vector<1x1x8x128xf32>
    %23 = vector.shape_cast %22 : vector<1x1x8x128xf32> to vector<1x8x128xf32>
    %cst_11 = arith.constant 0.000000e+00 : f32
    %24 = vector.broadcast %cst_11 : f32 to vector<1x8x128xf32>
    %25 = arith.select %13, %23, %24 : vector<1x8x128xi1>, vector<1x8x128xf32>
    %cst_12 = arith.constant 5.000000e-01 : f32
    %26 = vector.broadcast %cst_12 : f32 to vector<1x8x128xf32>
    %27 = arith.mulf %26, %20 : vector<1x8x128xf32>
    %28 = math.tanh %27 : vector<1x8x128xf32>
    %cst_13 = arith.constant 5.000000e-01 : f32
    %29 = vector.broadcast %cst_13 : f32 to vector<1x8x128xf32>
    %30 = arith.mulf %29, %28 : vector<1x8x128xf32>
    %cst_14 = arith.constant 5.000000e-01 : f32
    %31 = vector.broadcast %cst_14 : f32 to vector<1x8x128xf32>
    %32 = arith.addf %30, %31 : vector<1x8x128xf32>
    %33 = arith.mulf %32, %15 : vector<1x8x128xf32>
    %34 = arith.mulf %33, %25 : vector<1x8x128xf32>
    %cst_15 = arith.constant dense<0.000000e+00> : vector<8x128xf32>
    %35 = vector.multi_reduction <add>, %34, %cst_15 [0] : vector<1x8x128xf32> to vector<8x128xf32>
    %36 = arith.addf %8, %35 : vector<8x128xf32>
    %cst_16 = arith.constant dense<0.000000e+00> : vector<8x128xf32>
    %37 = vector.multi_reduction <add>, %33, %cst_16 [0] : vector<1x8x128xf32> to vector<8x128xf32>
    %38 = arith.addf %8, %37 : vector<8x128xf32>
    %cst_17 = arith.constant dense<0.000000e+00> : vector<8x128xf32>
    %39 = vector.multi_reduction <add>, %25, %cst_17 [0] : vector<1x8x128xf32> to vector<8x128xf32>
    %40 = arith.addf %8, %39 : vector<8x128xf32>
    %41 = arith.subf %15, %33 : vector<1x8x128xf32>
    %42 = arith.subf %41, %25 : vector<1x8x128xf32>
    %43 = arith.addf %42, %34 : vector<1x8x128xf32>
    %cst_18 = arith.constant dense<0.000000e+00> : vector<8x128xf32>
    %44 = vector.multi_reduction <add>, %43, %cst_18 [0] : vector<1x8x128xf32> to vector<8x128xf32>
    %45 = arith.addf %8, %44 : vector<8x128xf32>
    %c1_i32_19 = arith.constant 1 : i32
    %c0_20 = arith.constant 0 : index
    %c0_21 = arith.constant 0 : index
    %c0_22 = arith.constant 0 : index
    %c0_23 = arith.constant 0 : index
    %46 = vector.load %arg5[%c0_20, %c0_21, %c0_22, %c0_23] : memref<1x1x8x128xf32, #tpu.memory_space<vmem>>, vector<1x1x8x128xf32>
    %47 = vector.shape_cast %46 : vector<1x1x8x128xf32> to vector<8x128xf32>
    %48 = arith.addf %47, %36 : vector<8x128xf32>
    %c0_24 = arith.constant 0 : index
    %c0_25 = arith.constant 0 : index
    %c0_26 = arith.constant 0 : index
    %c0_27 = arith.constant 0 : index
    %49 = vector.load %arg5[%c0_24, %c0_25, %c0_26, %c0_27] : memref<1x1x8x128xf32, #tpu.memory_space<vmem>>, vector<1x1x8x128xf32>
    %50 = vector.shape_cast %49 : vector<1x1x8x128xf32> to vector<8x128xf32>
    %51 = vector.shape_cast %48 : vector<8x128xf32> to vector<1x1x8x128xf32>
    tpu.vector_store %arg5[%c0_24, %c0_25, %c0_26, %c0_27], %51 {strides = array<i32>} : memref<1x1x8x128xf32, #tpu.memory_space<vmem>>, vector<1x1x8x128xf32>,
    %c0_28 = arith.constant 0 : index
    %c0_29 = arith.constant 0 : index
    %c0_30 = arith.constant 0 : index
    %c0_31 = arith.constant 0 : index
    %52 = vector.load %arg6[%c0_28, %c0_29, %c0_30, %c0_31] : memref<1x1x8x128xf32, #tpu.memory_space<vmem>>, vector<1x1x8x128xf32>
    %53 = vector.shape_cast %52 : vector<1x1x8x128xf32> to vector<8x128xf32>
    %54 = arith.addf %53, %38 : vector<8x128xf32>
    %c0_32 = arith.constant 0 : index
    %c0_33 = arith.constant 0 : index
    %c0_34 = arith.constant 0 : index
    %c0_35 = arith.constant 0 : index
    %55 = vector.load %arg6[%c0_32, %c0_33, %c0_34, %c0_35] : memref<1x1x8x128xf32, #tpu.memory_space<vmem>>, vector<1x1x8x128xf32>
    %56 = vector.shape_cast %55 : vector<1x1x8x128xf32> to vector<8x128xf32>
    %57 = vector.shape_cast %54 : vector<8x128xf32> to vector<1x1x8x128xf32>
    tpu.vector_store %arg6[%c0_32, %c0_33, %c0_34, %c0_35], %57 {strides = array<i32>} : memref<1x1x8x128xf32, #tpu.memory_space<vmem>>, vector<1x1x8x128xf32>,
    %c0_36 = arith.constant 0 : index
    %c0_37 = arith.constant 0 : index
    %c0_38 = arith.constant 0 : index
    %c0_39 = arith.constant 0 : index
    %58 = vector.load %arg7[%c0_36, %c0_37, %c0_38, %c0_39] : memref<1x1x8x128xf32, #tpu.memory_space<vmem>>, vector<1x1x8x128xf32>
    %59 = vector.shape_cast %58 : vector<1x1x8x128xf32> to vector<8x128xf32>
    %60 = arith.addf %59, %40 : vector<8x128xf32>
    %c0_40 = arith.constant 0 : index
    %c0_41 = arith.constant 0 : index
    %c0_42 = arith.constant 0 : index
    %c0_43 = arith.constant 0 : index
    %61 = vector.load %arg7[%c0_40, %c0_41, %c0_42, %c0_43] : memref<1x1x8x128xf32, #tpu.memory_space<vmem>>, vector<1x1x8x128xf32>
    %62 = vector.shape_cast %61 : vector<1x1x8x128xf32> to vector<8x128xf32>
    %63 = vector.shape_cast %60 : vector<8x128xf32> to vector<1x1x8x128xf32>
    tpu.vector_store %arg7[%c0_40, %c0_41, %c0_42, %c0_43], %63 {strides = array<i32>} : memref<1x1x8x128xf32, #tpu.memory_space<vmem>>, vector<1x1x8x128xf32>,
    %c0_44 = arith.constant 0 : index
    %c0_45 = arith.constant 0 : index
    %c0_46 = arith.constant 0 : index
    %c0_47 = arith.constant 0 : index
    %64 = vector.load %arg8[%c0_44, %c0_45, %c0_46, %c0_47] : memref<1x1x8x128xf32, #tpu.memory_space<vmem>>, vector<1x1x8x128xf32>
    %65 = vector.shape_cast %64 : vector<1x1x8x128xf32> to vector<8x128xf32>
    %66 = arith.addf %65, %45 : vector<8x128xf32>
    %c0_48 = arith.constant 0 : index
    %c0_49 = arith.constant 0 : index
    %c0_50 = arith.constant 0 : index
    %c0_51 = arith.constant 0 : index
    %67 = vector.load %arg8[%c0_48, %c0_49, %c0_50, %c0_51] : memref<1x1x8x128xf32, #tpu.memory_space<vmem>>, vector<1x1x8x128xf32>
    %68 = vector.shape_cast %67 : vector<1x1x8x128xf32> to vector<8x128xf32>
    %69 = vector.shape_cast %66 : vector<8x128xf32> to vector<1x1x8x128xf32>
    tpu.vector_store %arg8[%c0_48, %c0_49, %c0_50, %c0_51], %69 {strides = array<i32>} : memref<1x1x8x128xf32, #tpu.memory_space<vmem>>, vector<1x1x8x128xf32>,
    return
  }
  func.func @transform_0(%arg0: i32, %arg1: i32, %arg2: i32) -> (i32, i32, i32, i32) {
    %c1_i32 = arith.constant 1 : i32
    %0 = arith.muli %arg0, %c1_i32 : i32
    %1 = arith.addi %0, %arg2 : i32
    %c0_i32 = arith.constant 0 : i32
    %2 = arith.minsi %1, %c0_i32 : i32
    %c0_i32_0 = arith.constant 0 : i32
    %c0_i32_1 = arith.constant 0 : i32
    %c0_i32_2 = arith.constant 0 : i32
    return %arg1, %2, %c0_i32_0, %c0_i32_1 : i32, i32, i32, i32
  }
  func.func @transform_1(%arg0: i32, %arg1: i32, %arg2: i32) -> (i32, i32, i32, i32) {
    %c1_i32 = arith.constant 1 : i32
    %0 = arith.muli %arg0, %c1_i32 : i32
    %1 = arith.addi %0, %arg2 : i32
    %c0_i32 = arith.constant 0 : i32
    %2 = arith.minsi %1, %c0_i32 : i32
    %c0_i32_0 = arith.constant 0 : i32
    %c0_i32_1 = arith.constant 0 : i32
    %c0_i32_2 = arith.constant 0 : i32
    return %arg1, %2, %c0_i32_0, %c0_i32_1 : i32, i32, i32, i32
  }
  func.func @transform_2(%arg0: i32, %arg1: i32, %arg2: i32) -> (i32, i32, i32, i32) {
    %c0_i32 = arith.constant 0 : i32
    %c0_i32_0 = arith.constant 0 : i32
    %c0_i32_1 = arith.constant 0 : i32
    return %arg0, %arg1, %c0_i32, %c0_i32_0 : i32, i32, i32, i32
  }
  func.func @transform_3(%arg0: i32, %arg1: i32, %arg2: i32) -> (i32, i32, i32, i32) {
    %c0_i32 = arith.constant 0 : i32
    %c0_i32_0 = arith.constant 0 : i32
    %c0_i32_1 = arith.constant 0 : i32
    return %arg0, %arg1, %c0_i32, %c0_i32_0 : i32, i32, i32, i32
  }
  func.func @transform_4(%arg0: i32, %arg1: i32, %arg2: i32) -> (i32, i32, i32, i32) {
    %c0_i32 = arith.constant 0 : i32
    %c0_i32_0 = arith.constant 0 : i32
    %c0_i32_1 = arith.constant 0 : i32
    return %arg0, %arg1, %c0_i32, %c0_i32_0 : i32, i32, i32, i32
  }
  func.func @transform_5(%arg0: i32, %arg1: i32, %arg2: i32) -> (i32, i32, i32, i32) {
    %c0_i32 = arith.constant 0 : i32
    %c0_i32_0 = arith.constant 0 : i32
    %c0_i32_1 = arith.constant 0 : i32
    return %arg0, %arg1, %c0_i32, %c0_i32_0 : i32, i32, i32, i32
  }
}

</mosaic_0001>

<bundles_post_ra>
// kernel: tversky_focal.1
= control target key start
LH: loop header
LB: loop body
LE: loop exit
PB: predicated region body
PF: predicated region fallthrough
CT: control target
= control target key end

     0   :  { %s828_s18 = smov 0   ;;  %s830_s19 = smov 0   ;;  %s898_s0 = inlined_call_operand.vmem [shape: f32[2,1,8,128], index: 0, kind: input, shape index: {}]   ;;  %s899_s1 = inlined_call_operand.vmem [shape: f32[2,1,8,128], index: 1, kind: input, shape index: {}]   ;;  %s900_s2 = inlined_call_operand.vmem [shape: f32[2,2,8,128], index: 2, kind: output, shape index: {0}]   ;;  %s901_s3 = inlined_call_operand.vmem [shape: f32[2,2,8,128], index: 3, kind: output, shape index: {1}]   ;;  %s902_s4 = inlined_call_operand.vmem [shape: f32[2,2,8,128], index: 4, kind: output, shape index: {2}]   ;;  %s903_s5 = inlined_call_operand.vmem [shape: f32[2,2,8,128], index: 5, kind: output, shape index: {3}]  }
   0x1   :  { %s832_s20 = smov 0   ;;  %s834_s21 = smov 0  }
   0x2   :  { %s836_s22 = smov 0  }
   0x3 LB: > { %s31_s23 = sadd.s32 1, %s787_s20  ;;  %s35_s24 = sadd.s32 1, %s791_s21  ;;  %s795_s22 = sphi %s836_s22, %s16_s22   ;;  %s791_s21 = sphi %s834_s21, %s907_s21   ;;  %s787_s20 = sphi %s832_s20, %s906_s20   ;;  %s783_s19 = sphi %s830_s19, %s905_s19   ;;  %s779_s18 = sphi %s828_s18, %s904_s18  }
   0x4   : > { %p33_p0 = scmp.ge.s32.totalorder %s31_s23, 2  ;;  %p688_p1 = scmp.ge.s32.totalorder %s795_s22, 1 }
   0x5   : > { %p263_p2 = scmp.lt.s32.totalorder %s795_s22, 5 }
   0x6   : > { %s909_s23 = smov (%p33_p0, %s31_s23), 0  ;;  %s911_s24 = smov (!%p33_p0, %s35_s24), %s791_s21 }
   0x7   : > { %p264_p3 = pnand %p688_p1, %p263_p2  ;;  %p37_p4 = scmp.ge.s32.totalorder %s911_s24, 2 }
   0x8   : > { %p334_p5 = scmp.lt.s32.totalorder (!%p264_p3), %s783_s19, 0  ;;  %p336_p6 = scmp.lt.s32.totalorder (!%p264_p3), %s779_s18, 1  ;;  %v797_v6 = vmov (!%p264_p3), 0.0  }
   0x9   : > { %s913_s24 = smov (%p37_p4, %s911_s24), 0  ;;  %267 = sbr.rel (%p264_p3) target bundleno = 51 (0x33), region = 28 }
   0xa   : > { %p359_p7 = scmp.lt.s32.totalorder (!%p264_p3), %s783_s19, 1  ;;  %s400_s25 = ssub.s32 (!%p264_p3), 1, %s783_s19 }
   0xb   : > { %p749_p8 = scmp.gt.s32.totalorder (!%p264_p3), %s400_s25, 0  ;;  %v402_v3 = vstv (!%p264_p3), %s400_s25 }
   0xc   : > { %vm403_vm0 = vcmp.gt.s32.totalorder (!%p264_p3), %v402_v3, 0 }
   0xd   : > { %v705_v7 = vsel (!%p264_p3), %vm403_vm0, 1.0, %v797_v6 }
  0x10   : > { %s335_s26 = scalar_select %p334_p5, %s783_s19, 0 }
  0x11   : > { %s915_s18 = smov (!%p336_p6, %s779_s18), 1  ;;  %s919_s19 = smov (!%p359_p7, %s783_s19), 1 }
  0x12   : > { %s917_s26 = smov (!%p334_p5, %s335_s26), 0  ;;  %s697_s29 = sshll.u32 %s919_s19, 1 }
  0x13   : > { %s340_s27 = sadd.s32 %s917_s26, %s915_s18  ;;  %s364_s8 = sadd.s32 %s697_s29, %s915_s18 }
  0x14   : > { %s692_s28 = sshll.u32 %s340_s27, 3  ;;  %s698_s10 = sshll.u32 %s364_s8, 3 }
  0x15   : > { %s342_s7 = scalar_lea.vmem %s898_s0, %s692_s28  ;;  %s355_s13 = scalar_lea.vmem %s899_s1, %s692_s28 }
  0x16   : > { %s750_s9 = scalar_select %p749_p8, 255, 0 }
  0x17   : > { %s382_s16 = scalar_lea.vmem %s902_s4, %s698_s10  ;;  %s374_s19 = scalar_lea.vmem %s901_s3, %s698_s10 }
  0x18   : > { %v751_v0 = vld [vmem:[%s342_s7] sm:%s750_s9]  ;;  %s366_s28 = scalar_lea.vmem %s900_s2, %s698_s10  ;;  %s390_s30 = scalar_lea.vmem %s903_s5, %s698_s10 }
  0x19   : > { %v413_v1 = vmul.f32 0.5, %v751_v0  ;;  %v754_v2 = vld [vmem:[%s355_s13] sm:%s750_s9] }
  0x1a   : > { %438 = vst [vmem:[%s382_s16] sm:$0xff] %v754_v2 }
  0x1b   : > { %755 = vtanh.f32 %v413_v1 }
  0x25   : > { %v756_v4 = vpop.eup %755 }
  0x26   : > { %v415_v5 = vmul.f32 0.5, %v756_v4 }
  0x28   : > { %v416_v8 = vadd.f32 0.5, %v415_v5 }
  0x2a   : > { %v417_v9 = vmul.f32 %v705_v7, %v416_v8 }
  0x2c   : > { %v418_v10 = vmul.f32 %v754_v2, %v417_v9  ;;  %v425_v11 = vsub.f32 %v705_v7, %v417_v9  ;;  %435 = vst [vmem:[%s374_s19] sm:$0xff] %v417_v9 }
  0x2e   : > { %v426_v12 = vsub.f32 %v425_v11, %v754_v2  ;;  %432 = vst [vmem:[%s366_s28] sm:$0xff] %v418_v10 }
  0x30   : > { %v427_v13 = vadd.f32 %v426_v12, %v418_v10 }
  0x32   : > { %441 = vst [vmem:[%s390_s30] sm:$0xff] %v427_v13 }
  0x33 PF: > { %s16_s22 = sadd.s32 1, %s795_s22   ;;  %s904_s18 = smov %s787_s20 }
  0x34   : > { %p13_p9 = scmp.ge.s32.totalorder %s16_s22, 6   ;;  %s905_s19 = smov %s791_s21 }
  0x35   : > { %s906_s20 = smov %s909_s23  ;;  %s907_s21 = smov %s913_s24 }
  0x36   :  { %15 = sbr.rel (!%p13_p9) target bundleno = 3 (0x3), region = 103 }

</bundles_post_ra>
